<compile_context>
chip_gen: v7x
topology: tpu7x:2x2x1
jax: 0.10.0
libtpu: 0.0.40
codegen_flags: <defaults>
</compile_context>

<pallas_src>
import functools

import numpy as np
import jax
import jax.numpy as jnp
from jax.experimental import pallas as pl
from jax.experimental.pallas import tpu as pltpu


def _predictor_kernel(xpos_ref, ypos_ref, gnorm_ref,          # SMEM scalar tables
                      w_ref, xslab_ref,                        # VMEM blocks
                      out_ref, aux_ref,                        # outputs
                      acc_ref, px_ref, py_ref, gn_ref, nf_ref, # VMEM scratch
                      *, tH, cH, W, S, inv_d):
    """One grid step = (frame f, H-tile h, tap-row k); k is innermost.

    w_ref     : (1, S, tH, W)        raw weights for tap row k (exp in-kernel)
    xslab_ref : (1, 1, 3, tH+K-1, Wp) padded-frame slab for this H-tile
    out_ref   : (1, 3, tH, W)        RGB prediction (written on the last k)
    aux_ref   : (1, 4, tH, W)        [y-pos, x-pos, exp_norm, norm_factor]
    """
    k = pl.program_id(2)
    n_k = pl.num_programs(2)
    n_chunks = tH // cH

    @pl.when(k == 0)
    def _init():
        acc_ref[...] = jnp.zeros_like(acc_ref)
        px_ref[...] = jnp.zeros_like(px_ref)
        py_ref[...] = jnp.zeros_like(py_ref)
        gn_ref[...] = jnp.zeros_like(gn_ref)
        nf_ref[...] = jnp.zeros_like(nf_ref)

    xpos_k = xpos_ref[k]

    def process_chunk(r0):
        # Chunk accumulators live in vregs across all S taps; scratch refs are
        # touched once per chunk per k (bounds VMEM ld/st + spill traffic).
        acc = acc_ref[:, pl.ds(r0, cH), :]          # (3, cH, W)
        gn = gn_ref[pl.ds(r0, cH), :]               # (cH, W)
        py = py_ref[pl.ds(r0, cH), :]               # (cH, W)
        rowsum = jnp.zeros((cH, W), jnp.float32)
        for l in range(S):
            w_kl = jnp.exp(w_ref[0, l, pl.ds(r0, cH), :].astype(jnp.float32))
            rowsum = rowsum + w_kl
            py = py + ypos_ref[l] * w_kl
            gn = gn + gnorm_ref[k * S + l] * w_kl
            # TODO(synk): if the bundle shows vld+vrot overhead from the
            # lane-unaligned start `l`, load the full-width (3, cH, Wp) slab
            # once per chunk and derive the S shifted views with pltpu.roll.
            patch = xslab_ref[0, 0, :, pl.ds(r0 + k, cH), pl.ds(l, W)]  # (3,cH,W)
            acc = acc + w_kl[None, :, :] * patch
        acc_ref[:, pl.ds(r0, cH), :] = acc
        gn_ref[pl.ds(r0, cH), :] = gn
        py_ref[pl.ds(r0, cH), :] = py
        nf_ref[pl.ds(r0, cH), :] += rowsum
        px_ref[pl.ds(r0, cH), :] += xpos_k * rowsum

    if n_chunks == 1:
        process_chunk(0)
    else:
        def body(c, carry):
            process_chunk(pl.multiple_of(c * cH, cH))
            return carry
        jax.lax.fori_loop(0, n_chunks, body, 0)

    @pl.when(k == n_k - 1)
    def _fin():
        out_ref[0] = acc_ref[...]
        aux_ref[0, 0] = py_ref[...] * inv_d          # flip(-1): y-component first
        aux_ref[0, 1] = px_ref[...] * inv_d
        aux_ref[0, 2] = gn_ref[...] * inv_d
        aux_ref[0, 3] = nf_ref[...]


def _vmem_capacity_bytes():
    """Physical VMEM per TensorCore; conservative fallback (covers v7x)."""
    try:
        info = pltpu.get_tpu_info()
        for name in ("vmem_capacity_bytes", "vmem_size_bytes", "vmem_bytes"):
            v = getattr(info, name, None)
            if v:
                return int(v)
    except Exception:
        pass
    return 64 * 1024 * 1024


def _tile_need_bytes(tH, W, S, K, Wp, w_itemsize, w_bufs):
    sH = tH + K - 1
    return (w_bufs * S * tH * W * w_itemsize     # streamed weight buffers
            + 2 * 3 * sH * Wp * 4                # padded-frame slab (double buf)
            + 2 * (3 + 4) * tH * W * 4           # out + aux blocks (double buf)
            + (3 + 4) * tH * W * 4)              # VMEM scratch accumulators


def _pick_tile_h(H, W, S, K, Wp, w_itemsize, w_bufs, vmem_budget):
    """Largest H-tile (== H or a multiple of 8 dividing H) fitting the budget."""
    if H <= 8 or _tile_need_bytes(H, W, S, K, Wp, w_itemsize, w_bufs) <= vmem_budget:
        return H
    best = None
    t = 8
    while t < H:
        if H % t == 0 and _tile_need_bytes(t, W, S, K, Wp, w_itemsize,
                                           w_bufs) <= vmem_budget:
            best = t
        t += 8
    if best is not None:
        return best
    return 8 if H % 8 == 0 else H


def _pick_chunk_h(tH, W):
    """Chunk rows so ~6 live f32 planes of (cH, W) stay comfortably in vregs."""
    if tH * W <= 4096 or tH % 8 != 0:
        return tH
    best = 8
    t = 8
    while t <= tH:
        if tH % t == 0 and t * W <= 4096:
            best = t
        t += 8
    return best


class SoftMultiFramePredictorPallas:
    def __init__(self, height, width, n_frames, rank, world_size,
                 weight_sl=31, downsample_factor=1, tile_h=None,
                 weight_stream_dtype=jnp.float32, weight_buffers=None):
        assert weight_sl % 2 == 1
        assert downsample_factor == 1  # TODO(synk): support downsample_factor > 1
        self.height = height
        self.width = width
        self.n_frames = n_frames
        self.weight_sl = weight_sl
        self.downsample_factor = downsample_factor
        K = weight_sl + downsample_factor - 1
        self.begin_sl = rank * K // world_size
        self.end_sl = (rank + 1) * K // world_size
        self.size_sl = self.end_sl - self.begin_sl
        self.K = K
        self.S = self.size_sl
        if tile_h is not None:
            assert height % tile_h == 0 and (tile_h == height or tile_h % 8 == 0)
        self.tile_h = tile_h
        self.weight_stream_dtype = weight_stream_dtype
        self.weight_buffers = weight_buffers  # None -> default double buffering

        # Parameter stored natively in kernel (tap-major) layout (n, K*S, H, W):
        # the forward never transposes the big K*S*H*W tensor (init matches
        # torch: ones * 0.01, layout-independent).
        self.weights_km = jnp.full((n_frames, K * self.S, height, width),
                                   0.01, jnp.float32)

        # sampling grid (deterministic, from config)
        tg = weight_sl // 2 + (downsample_factor - 1) / 2
        xpos = np.linspace(-tg, tg, K).astype(np.float32)
        ypos = np.linspace(-tg, tg, K).astype(np.float32)[self.begin_sl:self.end_sl]
        gxm, gym = np.meshgrid(xpos, ypos, indexing='ij')      # (K, S)
        self.grid = jnp.asarray(np.stack([gxm, gym], axis=-1), jnp.float32)
        self._xpos = jnp.asarray(xpos, jnp.float32)            # (K,)
        self._ypos = jnp.asarray(ypos, jnp.float32)            # (S,)
        self._gnorm = jnp.asarray(np.sqrt(gxm ** 2 + gym ** 2).reshape(-1),
                                  jnp.float32)                 # (K*S,)

    @property
    def weights(self):
        """Torch-layout view (1, n, H, W, K, S) of the tap-major parameter."""
        n, KS, H, W = self.weights_km.shape
        return jnp.transpose(self.weights_km, (0, 2, 3, 1)).reshape(
            1, n, H, W, self.K, self.S)

    def _pad(self, x):
        # x: (n_frames, 3, H*d, W*d); replicate-pad exactly as the torch branches.
        t = self.weight_sl // 2
        rem = self.weight_sl - self.end_sl
        if t >= self.begin_sl and t >= rem:
            return jnp.pad(x, ((0, 0), (0, 0), (t, t),
                               (t - self.begin_sl, t - rem)), mode='edge')
        elif t >= self.begin_sl:
            xp = jnp.pad(x, ((0, 0), (0, 0), (t, t), (t - self.begin_sl, 0)),
                         mode='edge')
            return xp[:, :, :, 0:-(rem - t)]
        elif t >= rem:
            xp = jnp.pad(x, ((0, 0), (0, 0), (t, t), (0, t - rem)), mode='edge')
            return xp[:, :, :, self.begin_sl - t:]
        else:
            xp = jnp.pad(x, ((0, 0), (0, 0), (t, t), (0, 0)), mode='edge')
            return xp[:, :, :, self.begin_sl - t:-(rem - t)]

    def __call__(self, in_frames, weights=None):
        H, W, K, S = self.height, self.width, self.K, self.S
        d, n = self.downsample_factor, self.n_frames
        KS = K * S
        in_shape = in_frames.shape

        if weights is None:
            w_km = self.weights_km
            w_nat = None
        else:
            w_nat = weights.reshape(1, n, H, W, K, S).astype(jnp.float32)
            # TODO(synk): callers that can hand over tap-major (n, K*S, H, W)
            # weights skip this transpose entirely.
            w_km = jnp.transpose(w_nat[0].reshape(n, H, W, KS), (0, 3, 1, 2))
        w_km = w_km.astype(self.weight_stream_dtype)
        w_itemsize = jnp.dtype(self.weight_stream_dtype).itemsize

        x = in_frames.reshape(n, 3, H * d, W * d)
        xpad = self._pad(x).astype(jnp.float32)          # (n, 3, H+2t, W+S-1)
        Hp, Wp = int(xpad.shape[2]), int(xpad.shape[3])

        phys = _vmem_capacity_bytes()
        w_bufs = self.weight_buffers if self.weight_buffers else 2
        if self.tile_h is not None:
            tH = self.tile_h
        else:
            tH = _pick_tile_h(H, W, S, K, Wp, w_itemsize, w_bufs,
                              int(phys * 0.6))
        n_h = H // tH
        cH = _pick_chunk_h(tH, W)
        sH = tH + K - 1

        # Overlapping per-tile slabs of the padded frame: only (3, sH, Wp) is
        # resident per grid step instead of the whole (3, Hp, Wp) frame.
        if n_h == 1:
            xslab = xpad[:, None]                               # (n, 1, 3, Hp, Wp)
        else:
            xslab = jnp.stack(
                [xpad[:, :, h * tH:h * tH + sH, :] for h in range(n_h)], axis=1)

        # Megacore balance: larger parallel extent first; tap-row k innermost.
        frames_first = n >= n_h
        if frames_first:
            grid = (n, n_h, K)
            def idx(fn):
                return lambda f, h, c: fn(f, h, c)
        else:
            grid = (n_h, n, K)
            def idx(fn):
                return lambda h, f, c: fn(f, h, c)

        w_spec_kwargs = {}
        if self.weight_buffers is not None:
            w_spec_kwargs["pipeline_mode"] = pl.Buffered(self.weight_buffers)
        w_spec = pl.BlockSpec((1, S, tH, W), idx(lambda f, h, c: (f, c, h, 0)),
                              **w_spec_kwargs)
        x_spec = pl.BlockSpec((1, 1, 3, sH, Wp),
                              idx(lambda f, h, c: (f, h, 0, 0, 0)))
        out_spec = pl.BlockSpec((1, 3, tH, W), idx(lambda f, h, c: (f, 0, h, 0)))
        aux_spec = pl.BlockSpec((1, 4, tH, W), idx(lambda f, h, c: (f, 0, h, 0)))
        smem_spec = pl.BlockSpec(memory_space=pltpu.MemorySpace.SMEM)

        # Generation-aware scoped-VMEM limit (always set explicitly).
        est_bytes = _tile_need_bytes(tH, W, S, K, Wp, w_itemsize, w_bufs)
        cap = max(32 * 1024 * 1024, int(phys * 3 // 4))
        vmem_limit = int(min(cap, max(est_bytes * 5 // 4 + (4 << 20), 16 << 20)))

        kernel = functools.partial(_predictor_kernel, tH=tH, cH=cH, W=W, S=S,
                                   inv_d=1.0 / d)
        out_shapes = (
            jax.ShapeDtypeStruct((n, 3, H, W), jnp.float32),
            jax.ShapeDtypeStruct((n, 4, H, W), jnp.float32),
        )
        grid_spec = pltpu.PrefetchScalarGridSpec(
            num_scalar_prefetch=0,
            grid=grid,
            in_specs=[smem_spec, smem_spec, smem_spec, w_spec, x_spec],
            out_specs=[out_spec, aux_spec],
            scratch_shapes=[
                pltpu.VMEM((3, tH, W), jnp.float32),   # RGB accumulator
                pltpu.VMEM((tH, W), jnp.float32),      # x-position accumulator
                pltpu.VMEM((tH, W), jnp.float32),      # y-position accumulator
                pltpu.VMEM((tH, W), jnp.float32),      # |grid|-weighted accumulator
                pltpu.VMEM((tH, W), jnp.float32),      # norm-factor accumulator
            ],
        )

        out_k, aux = pl.pallas_call(
            kernel,
            out_shape=out_shapes,
            grid_spec=grid_spec,
            compiler_params=pltpu.CompilerParams(
                dimension_semantics=("parallel", "parallel", "arbitrary"),
                vmem_limit_bytes=vmem_limit),
        )(self._xpos, self._ypos, self._gnorm, w_km, xslab)

        b0, b1 = in_shape[0], in_shape[1]
        out = out_k.reshape(b0, b1, 3, H, W)
        positions = jnp.transpose(aux[:, 0:2], (0, 2, 3, 1)).reshape(b0, b1, H, W, 2)
        exp_norm = aux[:, 2].reshape(1, n, H, W)
        norm_factor = aux[:, 3].reshape(1, n, H, W)

        # exp(weights) in torch layout: a single XLA op outside the kernel
        # (fuses with the layout change under jit, DCE'd if unused).
        if w_nat is None:
            w_nat = jnp.transpose(self.weights_km, (0, 2, 3, 1)).reshape(
                1, n, H, W, K, S)
        exp_weights = jnp.exp(w_nat)

        return {'out': out, 'positions': positions, 'input': in_frames,
                'weights': exp_weights, 'exp_norm': exp_norm,
                'norm_factor': norm_factor}


def reference_forward(pred, in_frames, weights=None):
    # Pure-JAX reference reproducing the PyTorch einsums (validation only).
    H, W, K, S = pred.height, pred.width, pred.K, pred.S
    d, n = pred.downsample_factor, pred.n_frames
    if weights is None:
        weights = pred.weights
    wf = weights.reshape(1, n, H, W, K * S).astype(jnp.float32)
    norm_factor = jnp.sum(jnp.exp(wf), axis=-1)
    ew = jnp.exp(wf).reshape(1, n, H, W, K, S)
    x = in_frames.reshape(n, 3, H * d, W * d)
    xpad = pred._pad(x).astype(jnp.float32)
    ii = np.arange(H)[:, None, None, None] * d + np.arange(K)[None, None, :, None]
    jj = np.arange(W)[None, :, None, None] * d + np.arange(S)[None, None, None, :]
    x_unf = xpad[:, :, ii, jj][None]                      # (1, n, 3, H, W, K, S)
    out = jnp.einsum('bnijkl,bncijkl->bncij', ew, x_unf)
    pos = jnp.einsum('bnijkl,klm->bnijm', ew, pred.grid) / d
    pos = pos[..., ::-1]
    en = jnp.einsum('bnijkl,kl->bnij', ew,
                    jnp.linalg.norm(pred.grid, axis=-1)) / d
    return {'out': out, 'positions': pos, 'weights': ew,
            'exp_norm': en, 'norm_factor': norm_factor}


if __name__ == "__main__":
    key = jax.random.PRNGKey(0)
    k1, k2 = jax.random.split(key)

    configs = [
        # (H, W, n_frames, weight_sl, world_size, rank, tile_h)
        (8, 16, 2, 5, 1, 0, None),    # single tile
        (16, 16, 2, 5, 1, 0, 8),      # 2 H-tiles (slab path)
        (8, 16, 2, 5, 2, 1, None),    # rank/world_size slicing (S != K)
        (16, 512, 2, 5, 1, 0, 16),    # in-kernel chunk loop (n_chunks = 2)
        (32, 16, 1, 5, 1, 0, 8),      # H-major grid order (n_h > n_frames)
    ]
    for (H, W, nf, wsl, ws, rk, th) in configs:
        pred = SoftMultiFramePredictorPallas(H, W, nf, rank=rk, world_size=ws,
                                             weight_sl=wsl, downsample_factor=1,
                                             tile_h=th)
        in_frames = jax.random.normal(k1, (1, nf, 3, H, W), jnp.float32)
        ext_weights = 0.1 * jax.random.normal(
            k2, (1, nf, H, W, pred.K, pred.S), jnp.float32)

        # Run once with the module's own parameter (weights=None) and once with
        # an explicit weights tensor (the forward supports both).
        for w in (None, ext_weights):
            res = pred(in_frames, weights=w)
            jax.block_until_ready(res['out'])
            ref = reference_forward(pred, in_frames, weights=w)
            for name in ('out', 'positions', 'weights', 'exp_norm', 'norm_factor'):
                np.testing.assert_allclose(np.asarray(res[name]),
                                           np.asarray(ref[name]),
                                           rtol=1e-5, atol=2e-5)

    # bf16 weight-streaming perf mode (v5e ~2x HBM win): looser tolerance
    # against the f32 reference since the kernel rounds weights to bf16.
    pred16 = SoftMultiFramePredictorPallas(16, 128, 2, rank=0, world_size=1,
                                           weight_sl=5, downsample_factor=1,
                                           weight_stream_dtype=jnp.bfloat16)
    in_frames = jax.random.normal(k1, (1, 2, 3, 16, 128), jnp.float32)
    ext_weights = 0.1 * jax.random.normal(k2, (1, 2, 16, 128, 5, 5), jnp.float32)
    res = pred16(in_frames, weights=ext_weights)
    jax.block_until_ready(res['out'])
    ref = reference_forward(pred16, in_frames, weights=ext_weights)
    for name in ('out', 'positions', 'exp_norm', 'norm_factor'):
        np.testing.assert_allclose(np.asarray(res[name]), np.asarray(ref[name]),
                                   rtol=2e-2, atol=2e-2)

    print("KERNEL_OK")
</pallas_src>

<mosaic_0001>
module attributes {stable_mosaic.version = 11 : i64} {
  func.func @_predictor_kernel(%arg0: i32, %arg1: i32, %arg2: i32, %arg3: memref<5xf32, #tpu.memory_space<smem>>, %arg4: memref<5xf32, #tpu.memory_space<smem>>, %arg5: memref<25xf32, #tpu.memory_space<smem>>, %arg6: memref<1x5x8x16xf32, #tpu.memory_space<vmem>>, %arg7: memref<1x1x3x12x20xf32, #tpu.memory_space<vmem>>, %arg8: memref<1x3x8x16xf32, #tpu.memory_space<vmem>>, %arg9: memref<1x4x8x16xf32, #tpu.memory_space<vmem>>, %arg10: memref<3x8x16xf32, #tpu.memory_space<vmem>>, %arg11: memref<8x16xf32, #tpu.memory_space<vmem>>, %arg12: memref<8x16xf32, #tpu.memory_space<vmem>>, %arg13: memref<8x16xf32, #tpu.memory_space<vmem>>, %arg14: memref<8x16xf32, #tpu.memory_space<vmem>>) attributes {dimension_semantics = [#tpu.dimension_semantics<parallel>, #tpu.dimension_semantics<parallel>, #tpu.dimension_semantics<arbitrary>], iteration_bounds = array<i64: 2, 1, 5>, scalar_prefetch = 0 : i64, scratch_operands = 5 : i64, tpu.core_type = #tpu.core_type<tc>, window_params = [{transform_indices = @transform_0, window_bounds = array<i64: 5>}, {transform_indices = @transform_1, window_bounds = array<i64: 5>}, {transform_indices = @transform_2, window_bounds = array<i64: 25>}, {transform_indices = @transform_3, window_bounds = array<i64: 1, 5, 8, 16>}, {transform_indices = @transform_4, window_bounds = array<i64: 1, 1, 3, 12, 20>}, {transform_indices = @transform_5, window_bounds = array<i64: 1, 3, 8, 16>}, {transform_indices = @transform_6, window_bounds = array<i64: 1, 4, 8, 16>}]} {
    %c0_i32 = arith.constant 0 : i32
    %0 = arith.cmpi eq, %arg2, %c0_i32 : i32
    %1 = arith.extui %0 : i1 to i32
    %c0_i32_0 = arith.constant 0 : i32
    %2 = arith.cmpi ne, %1, %c0_i32_0 : i32
    scf.if %2 {
      %cst_75 = arith.constant 0.000000e+00 : f32
      %138 = vector.broadcast %cst_75 : f32 to vector<3x8x16xf32>
      %c0_76 = arith.constant 0 : index
      %c0_77 = arith.constant 0 : index
      %c0_78 = arith.constant 0 : index
      %139 = vector.load %arg10[%c0_76, %c0_77, %c0_78] : memref<3x8x16xf32, #tpu.memory_space<vmem>>, vector<3x8x16xf32>
      tpu.vector_store %arg10[%c0_76, %c0_77, %c0_78], %138 {strides = array<i32>} : memref<3x8x16xf32, #tpu.memory_space<vmem>>, vector<3x8x16xf32>,
      %cst_79 = arith.constant 0.000000e+00 : f32
      %140 = vector.broadcast %cst_79 : f32 to vector<8x16xf32>
      %c0_80 = arith.constant 0 : index
      %c0_81 = arith.constant 0 : index
      %141 = vector.load %arg11[%c0_80, %c0_81] : memref<8x16xf32, #tpu.memory_space<vmem>>, vector<8x16xf32>
      tpu.vector_store %arg11[%c0_80, %c0_81], %140 {strides = array<i32>} : memref<8x16xf32, #tpu.memory_space<vmem>>, vector<8x16xf32>,
      %cst_82 = arith.constant 0.000000e+00 : f32
      %142 = vector.broadcast %cst_82 : f32 to vector<8x16xf32>
      %c0_83 = arith.constant 0 : index
      %c0_84 = arith.constant 0 : index
      %143 = vector.load %arg12[%c0_83, %c0_84] : memref<8x16xf32, #tpu.memory_space<vmem>>, vector<8x16xf32>
      tpu.vector_store %arg12[%c0_83, %c0_84], %142 {strides = array<i32>} : memref<8x16xf32, #tpu.memory_space<vmem>>, vector<8x16xf32>,
      %cst_85 = arith.constant 0.000000e+00 : f32
      %144 = vector.broadcast %cst_85 : f32 to vector<8x16xf32>
      %c0_86 = arith.constant 0 : index
      %c0_87 = arith.constant 0 : index
      %145 = vector.load %arg13[%c0_86, %c0_87] : memref<8x16xf32, #tpu.memory_space<vmem>>, vector<8x16xf32>
      tpu.vector_store %arg13[%c0_86, %c0_87], %144 {strides = array<i32>} : memref<8x16xf32, #tpu.memory_space<vmem>>, vector<8x16xf32>,
      %cst_88 = arith.constant 0.000000e+00 : f32
      %146 = vector.broadcast %cst_88 : f32 to vector<8x16xf32>
      %c0_89 = arith.constant 0 : index
      %c0_90 = arith.constant 0 : index
      %147 = vector.load %arg14[%c0_89, %c0_90] : memref<8x16xf32, #tpu.memory_space<vmem>>, vector<8x16xf32>
      tpu.vector_store %arg14[%c0_89, %c0_90], %146 {strides = array<i32>} : memref<8x16xf32, #tpu.memory_space<vmem>>, vector<8x16xf32>,
    } else {
    }
    %3 = arith.index_cast %arg2 : i32 to index
    %4 = memref.load %arg3[%3] : memref<5xf32, #tpu.memory_space<smem>>
    %c0 = arith.constant 0 : index
    %c0_1 = arith.constant 0 : index
    %c0_2 = arith.constant 0 : index
    %5 = vector.load %arg10[%c0, %c0_1, %c0_2] : memref<3x8x16xf32, #tpu.memory_space<vmem>>, vector<3x8x16xf32>
    %c0_3 = arith.constant 0 : index
    %c0_4 = arith.constant 0 : index
    %6 = vector.load %arg13[%c0_3, %c0_4] : memref<8x16xf32, #tpu.memory_space<vmem>>, vector<8x16xf32>
    %c0_5 = arith.constant 0 : index
    %c0_6 = arith.constant 0 : index
    %7 = vector.load %arg12[%c0_5, %c0_6] : memref<8x16xf32, #tpu.memory_space<vmem>>, vector<8x16xf32>
    %cst = arith.constant 0.000000e+00 : f32
    %8 = vector.broadcast %cst : f32 to vector<8x16xf32>
    %c0_7 = arith.constant 0 : index
    %c0_8 = arith.constant 0 : index
    %c0_9 = arith.constant 0 : index
    %c0_10 = arith.constant 0 : index
    %9 = vector.load %arg6[%c0_7, %c0_8, %c0_9, %c0_10] : memref<1x5x8x16xf32, #tpu.memory_space<vmem>>, vector<1x1x8x16xf32>
    %10 = vector.shape_cast %9 : vector<1x1x8x16xf32> to vector<8x16xf32>
    %11 = math.exp %10 : vector<8x16xf32>
    %12 = arith.addf %8, %11 : vector<8x16xf32>
    %c0_11 = arith.constant 0 : index
    %13 = memref.load %arg4[%c0_11] : memref<5xf32, #tpu.memory_space<smem>>
    %14 = vector.broadcast %13 : f32 to vector<8x16xf32>
    %15 = arith.mulf %14, %11 : vector<8x16xf32>
    %16 = arith.addf %7, %15 : vector<8x16xf32>
    %c5_i32 = arith.constant 5 : i32
    %17 = arith.muli %arg2, %c5_i32 : i32
    %c0_i32_12 = arith.constant 0 : i32
    %18 = arith.addi %17, %c0_i32_12 : i32
    %19 = arith.index_cast %18 : i32 to index
    %20 = memref.load %arg5[%19] : memref<25xf32, #tpu.memory_space<smem>>
    %21 = vector.broadcast %20 : f32 to vector<8x16xf32>
    %22 = arith.mulf %21, %11 : vector<8x16xf32>
    %23 = arith.addf %6, %22 : vector<8x16xf32>
    %c0_i32_13 = arith.constant 0 : i32
    %24 = arith.addi %c0_i32_13, %arg2 : i32
    %c0_14 = arith.constant 0 : index
    %c0_15 = arith.constant 0 : index
    %c0_16 = arith.constant 0 : index
    %25 = arith.index_cast %24 : i32 to index
    %c0_17 = arith.constant 0 : index
    %26 = vector.load %arg7[%c0_14, %c0_15, %c0_16, %25, %c0_17] : memref<1x1x3x12x20xf32, #tpu.memory_space<vmem>>, vector<1x1x3x8x16xf32>
    %27 = vector.shape_cast %26 : vector<1x1x3x8x16xf32> to vector<3x8x16xf32>
    %28 = vector.shape_cast %11 : vector<8x16xf32> to vector<1x8x16xf32>
    %29 = vector.broadcast %28 : vector<1x8x16xf32> to vector<3x8x16xf32>
    %30 = arith.mulf %29, %27 : vector<3x8x16xf32>
    %31 = arith.addf %5, %30 : vector<3x8x16xf32>
    %c0_18 = arith.constant 0 : index
    %c1 = arith.constant 1 : index
    %c0_19 = arith.constant 0 : index
    %c0_20 = arith.constant 0 : index
    %32 = vector.load %arg6[%c0_18, %c1, %c0_19, %c0_20] : memref<1x5x8x16xf32, #tpu.memory_space<vmem>>, vector<1x1x8x16xf32>
    %33 = vector.shape_cast %32 : vector<1x1x8x16xf32> to vector<8x16xf32>
    %34 = math.exp %33 : vector<8x16xf32>
    %35 = arith.addf %12, %34 : vector<8x16xf32>
    %c1_21 = arith.constant 1 : index
    %36 = memref.load %arg4[%c1_21] : memref<5xf32, #tpu.memory_space<smem>>
    %37 = vector.broadcast %36 : f32 to vector<8x16xf32>
    %38 = arith.mulf %37, %34 : vector<8x16xf32>
    %39 = arith.addf %16, %38 : vector<8x16xf32>
    %c5_i32_22 = arith.constant 5 : i32
    %40 = arith.muli %arg2, %c5_i32_22 : i32
    %c1_i32 = arith.constant 1 : i32
    %41 = arith.addi %40, %c1_i32 : i32
    %42 = arith.index_cast %41 : i32 to index
    %43 = memref.load %arg5[%42] : memref<25xf32, #tpu.memory_space<smem>>
    %44 = vector.broadcast %43 : f32 to vector<8x16xf32>
    %45 = arith.mulf %44, %34 : vector<8x16xf32>
    %46 = arith.addf %23, %45 : vector<8x16xf32>
    %c0_i32_23 = arith.constant 0 : i32
    %47 = arith.addi %c0_i32_23, %arg2 : i32
    %c0_24 = arith.constant 0 : index
    %c0_25 = arith.constant 0 : index
    %c0_26 = arith.constant 0 : index
    %48 = arith.index_cast %47 : i32 to index
    %c1_27 = arith.constant 1 : index
    %49 = vector.load %arg7[%c0_24, %c0_25, %c0_26, %48, %c1_27] : memref<1x1x3x12x20xf32, #tpu.memory_space<vmem>>, vector<1x1x3x8x16xf32>
    %50 = vector.shape_cast %49 : vector<1x1x3x8x16xf32> to vector<3x8x16xf32>
    %51 = vector.shape_cast %34 : vector<8x16xf32> to vector<1x8x16xf32>
    %52 = vector.broadcast %51 : vector<1x8x16xf32> to vector<3x8x16xf32>
    %53 = arith.mulf %52, %50 : vector<3x8x16xf32>
    %54 = arith.addf %31, %53 : vector<3x8x16xf32>
    %c0_28 = arith.constant 0 : index
    %c2 = arith.constant 2 : index
    %c0_29 = arith.constant 0 : index
    %c0_30 = arith.constant 0 : index
    %55 = vector.load %arg6[%c0_28, %c2, %c0_29, %c0_30] : memref<1x5x8x16xf32, #tpu.memory_space<vmem>>, vector<1x1x8x16xf32>
    %56 = vector.shape_cast %55 : vector<1x1x8x16xf32> to vector<8x16xf32>
    %57 = math.exp %56 : vector<8x16xf32>
    %58 = arith.addf %35, %57 : vector<8x16xf32>
    %c2_31 = arith.constant 2 : index
    %59 = memref.load %arg4[%c2_31] : memref<5xf32, #tpu.memory_space<smem>>
    %60 = vector.broadcast %59 : f32 to vector<8x16xf32>
    %61 = arith.mulf %60, %57 : vector<8x16xf32>
    %62 = arith.addf %39, %61 : vector<8x16xf32>
    %c5_i32_32 = arith.constant 5 : i32
    %63 = arith.muli %arg2, %c5_i32_32 : i32
    %c2_i32 = arith.constant 2 : i32
    %64 = arith.addi %63, %c2_i32 : i32
    %65 = arith.index_cast %64 : i32 to index
    %66 = memref.load %arg5[%65] : memref<25xf32, #tpu.memory_space<smem>>
    %67 = vector.broadcast %66 : f32 to vector<8x16xf32>
    %68 = arith.mulf %67, %57 : vector<8x16xf32>
    %69 = arith.addf %46, %68 : vector<8x16xf32>
    %c0_i32_33 = arith.constant 0 : i32
    %70 = arith.addi %c0_i32_33, %arg2 : i32
    %c0_34 = arith.constant 0 : index
    %c0_35 = arith.constant 0 : index
    %c0_36 = arith.constant 0 : index
    %71 = arith.index_cast %70 : i32 to index
    %c2_37 = arith.constant 2 : index
    %72 = vector.load %arg7[%c0_34, %c0_35, %c0_36, %71, %c2_37] : memref<1x1x3x12x20xf32, #tpu.memory_space<vmem>>, vector<1x1x3x8x16xf32>
    %73 = vector.shape_cast %72 : vector<1x1x3x8x16xf32> to vector<3x8x16xf32>
    %74 = vector.shape_cast %57 : vector<8x16xf32> to vector<1x8x16xf32>
    %75 = vector.broadcast %74 : vector<1x8x16xf32> to vector<3x8x16xf32>
    %76 = arith.mulf %75, %73 : vector<3x8x16xf32>
    %77 = arith.addf %54, %76 : vector<3x8x16xf32>
    %c0_38 = arith.constant 0 : index
    %c3 = arith.constant 3 : index
    %c0_39 = arith.constant 0 : index
    %c0_40 = arith.constant 0 : index
    %78 = vector.load %arg6[%c0_38, %c3, %c0_39, %c0_40] : memref<1x5x8x16xf32, #tpu.memory_space<vmem>>, vector<1x1x8x16xf32>
    %79 = vector.shape_cast %78 : vector<1x1x8x16xf32> to vector<8x16xf32>
    %80 = math.exp %79 : vector<8x16xf32>
    %81 = arith.addf %58, %80 : vector<8x16xf32>
    %c3_41 = arith.constant 3 : index
    %82 = memref.load %arg4[%c3_41] : memref<5xf32, #tpu.memory_space<smem>>
    %83 = vector.broadcast %82 : f32 to vector<8x16xf32>
    %84 = arith.mulf %83, %80 : vector<8x16xf32>
    %85 = arith.addf %62, %84 : vector<8x16xf32>
    %c5_i32_42 = arith.constant 5 : i32
    %86 = arith.muli %arg2, %c5_i32_42 : i32
    %c3_i32 = arith.constant 3 : i32
    %87 = arith.addi %86, %c3_i32 : i32
    %88 = arith.index_cast %87 : i32 to index
    %89 = memref.load %arg5[%88] : memref<25xf32, #tpu.memory_space<smem>>
    %90 = vector.broadcast %89 : f32 to vector<8x16xf32>
    %91 = arith.mulf %90, %80 : vector<8x16xf32>
    %92 = arith.addf %69, %91 : vector<8x16xf32>
    %c0_i32_43 = arith.constant 0 : i32
    %93 = arith.addi %c0_i32_43, %arg2 : i32
    %c0_44 = arith.constant 0 : index
    %c0_45 = arith.constant 0 : index
    %c0_46 = arith.constant 0 : index
    %94 = arith.index_cast %93 : i32 to index
    %c3_47 = arith.constant 3 : index
    %95 = vector.load %arg7[%c0_44, %c0_45, %c0_46, %94, %c3_47] : memref<1x1x3x12x20xf32, #tpu.memory_space<vmem>>, vector<1x1x3x8x16xf32>
    %96 = vector.shape_cast %95 : vector<1x1x3x8x16xf32> to vector<3x8x16xf32>
    %97 = vector.shape_cast %80 : vector<8x16xf32> to vector<1x8x16xf32>
    %98 = vector.broadcast %97 : vector<1x8x16xf32> to vector<3x8x16xf32>
    %99 = arith.mulf %98, %96 : vector<3x8x16xf32>
    %100 = arith.addf %77, %99 : vector<3x8x16xf32>
    %c0_48 = arith.constant 0 : index
    %c4 = arith.constant 4 : index
    %c0_49 = arith.constant 0 : index
    %c0_50 = arith.constant 0 : index
    %101 = vector.load %arg6[%c0_48, %c4, %c0_49, %c0_50] : memref<1x5x8x16xf32, #tpu.memory_space<vmem>>, vector<1x1x8x16xf32>
    %102 = vector.shape_cast %101 : vector<1x1x8x16xf32> to vector<8x16xf32>
    %103 = math.exp %102 : vector<8x16xf32>
    %104 = arith.addf %81, %103 : vector<8x16xf32>
    %c4_51 = arith.constant 4 : index
    %105 = memref.load %arg4[%c4_51] : memref<5xf32, #tpu.memory_space<smem>>
    %106 = vector.broadcast %105 : f32 to vector<8x16xf32>
    %107 = arith.mulf %106, %103 : vector<8x16xf32>
    %108 = arith.addf %85, %107 : vector<8x16xf32>
    %c5_i32_52 = arith.constant 5 : i32
    %109 = arith.muli %arg2, %c5_i32_52 : i32
    %c4_i32 = arith.constant 4 : i32
    %110 = arith.addi %109, %c4_i32 : i32
    %111 = arith.index_cast %110 : i32 to index
    %112 = memref.load %arg5[%111] : memref<25xf32, #tpu.memory_space<smem>>
    %113 = vector.broadcast %112 : f32 to vector<8x16xf32>
    %114 = arith.mulf %113, %103 : vector<8x16xf32>
    %115 = arith.addf %92, %114 : vector<8x16xf32>
    %c0_i32_53 = arith.constant 0 : i32
    %116 = arith.addi %c0_i32_53, %arg2 : i32
    %c0_54 = arith.constant 0 : index
    %c0_55 = arith.constant 0 : index
    %c0_56 = arith.constant 0 : index
    %117 = arith.index_cast %116 : i32 to index
    %c4_57 = arith.constant 4 : index
    %118 = vector.load %arg7[%c0_54, %c0_55, %c0_56, %117, %c4_57] : memref<1x1x3x12x20xf32, #tpu.memory_space<vmem>>, vector<1x1x3x8x16xf32>
    %119 = vector.shape_cast %118 : vector<1x1x3x8x16xf32> to vector<3x8x16xf32>
    %120 = vector.shape_cast %103 : vector<8x16xf32> to vector<1x8x16xf32>
    %121 = vector.broadcast %120 : vector<1x8x16xf32> to vector<3x8x16xf32>
    %122 = arith.mulf %121, %119 : vector<3x8x16xf32>
    %123 = arith.addf %100, %122 : vector<3x8x16xf32>
    %c0_58 = arith.constant 0 : index
    %c0_59 = arith.constant 0 : index
    %c0_60 = arith.constant 0 : index
    %124 = vector.load %arg10[%c0_58, %c0_59, %c0_60] : memref<3x8x16xf32, #tpu.memory_space<vmem>>, vector<3x8x16xf32>
    tpu.vector_store %arg10[%c0_58, %c0_59, %c0_60], %123 {strides = array<i32>} : memref<3x8x16xf32, #tpu.memory_space<vmem>>, vector<3x8x16xf32>,
    %c0_61 = arith.constant 0 : index
    %c0_62 = arith.constant 0 : index
    %125 = vector.load %arg13[%c0_61, %c0_62] : memref<8x16xf32, #tpu.memory_space<vmem>>, vector<8x16xf32>
    tpu.vector_store %arg13[%c0_61, %c0_62], %115 {strides = array<i32>} : memref<8x16xf32, #tpu.memory_space<vmem>>, vector<8x16xf32>,
    %c0_63 = arith.constant 0 : index
    %c0_64 = arith.constant 0 : index
    %126 = vector.load %arg12[%c0_63, %c0_64] : memref<8x16xf32, #tpu.memory_space<vmem>>, vector<8x16xf32>
    tpu.vector_store %arg12[%c0_63, %c0_64], %108 {strides = array<i32>} : memref<8x16xf32, #tpu.memory_space<vmem>>, vector<8x16xf32>,
    %c0_65 = arith.constant 0 : index
    %c0_66 = arith.constant 0 : index
    %127 = vector.load %arg14[%c0_65, %c0_66] : memref<8x16xf32, #tpu.memory_space<vmem>>, vector<8x16xf32>
    %128 = arith.addf %127, %104 : vector<8x16xf32>
    %c0_67 = arith.constant 0 : index
    %c0_68 = arith.constant 0 : index
    %129 = vector.load %arg14[%c0_67, %c0_68] : memref<8x16xf32, #tpu.memory_space<vmem>>, vector<8x16xf32>
    tpu.vector_store %arg14[%c0_67, %c0_68], %128 {strides = array<i32>} : memref<8x16xf32, #tpu.memory_space<vmem>>, vector<8x16xf32>,
    %c0_69 = arith.constant 0 : index
    %c0_70 = arith.constant 0 : index
    %130 = vector.load %arg11[%c0_69, %c0_70] : memref<8x16xf32, #tpu.memory_space<vmem>>, vector<8x16xf32>
    %131 = vector.broadcast %4 : f32 to vector<8x16xf32>
    %132 = arith.mulf %131, %104 : vector<8x16xf32>
    %133 = arith.addf %130, %132 : vector<8x16xf32>
    %c0_71 = arith.constant 0 : index
    %c0_72 = arith.constant 0 : index
    %134 = vector.load %arg11[%c0_71, %c0_72] : memref<8x16xf32, #tpu.memory_space<vmem>>, vector<8x16xf32>
    tpu.vector_store %arg11[%c0_71, %c0_72], %133 {strides = array<i32>} : memref<8x16xf32, #tpu.memory_space<vmem>>, vector<8x16xf32>,
    %c4_i32_73 = arith.constant 4 : i32
    %135 = arith.cmpi eq, %arg2, %c4_i32_73 : i32
    %136 = arith.extui %135 : i1 to i32
    %c0_i32_74 = arith.constant 0 : i32
    %137 = arith.cmpi ne, %136, %c0_i32_74 : i32
    scf.if %137 {
      %c0_75 = arith.constant 0 : index
      %c0_76 = arith.constant 0 : index
      %c0_77 = arith.constant 0 : index
      %138 = vector.load %arg10[%c0_75, %c0_76, %c0_77] : memref<3x8x16xf32, #tpu.memory_space<vmem>>, vector<3x8x16xf32>
      %c0_78 = arith.constant 0 : index
      %c0_79 = arith.constant 0 : index
      %c0_80 = arith.constant 0 : index
      %c0_81 = arith.constant 0 : index
      %139 = vector.load %arg8[%c0_78, %c0_79, %c0_80, %c0_81] : memref<1x3x8x16xf32, #tpu.memory_space<vmem>>, vector<1x3x8x16xf32>
      %140 = vector.shape_cast %139 : vector<1x3x8x16xf32> to vector<3x8x16xf32>
      %141 = vector.shape_cast %138 : vector<3x8x16xf32> to vector<1x3x8x16xf32>
      tpu.vector_store %arg8[%c0_78, %c0_79, %c0_80, %c0_81], %141 {strides = array<i32>} : memref<1x3x8x16xf32, #tpu.memory_space<vmem>>, vector<1x3x8x16xf32>,
      %c0_82 = arith.constant 0 : index
      %c0_83 = arith.constant 0 : index
      %142 = vector.load %arg12[%c0_82, %c0_83] : memref<8x16xf32, #tpu.memory_space<vmem>>, vector<8x16xf32>
      %cst_84 = arith.constant 1.000000e+00 : f32
      %143 = vector.broadcast %cst_84 : f32 to vector<8x16xf32>
      %144 = arith.mulf %142, %143 : vector<8x16xf32>
      %c0_85 = arith.constant 0 : index
      %c0_86 = arith.constant 0 : index
      %c0_87 = arith.constant 0 : index
      %c0_88 = arith.constant 0 : index
      %145 = vector.load %arg9[%c0_85, %c0_86, %c0_87, %c0_88] : memref<1x4x8x16xf32, #tpu.memory_space<vmem>>, vector<1x1x8x16xf32>
      %146 = vector.shape_cast %145 : vector<1x1x8x16xf32> to vector<8x16xf32>
      %147 = vector.shape_cast %144 : vector<8x16xf32> to vector<1x1x8x16xf32>
      tpu.vector_store %arg9[%c0_85, %c0_86, %c0_87, %c0_88], %147 {strides = array<i32>} : memref<1x4x8x16xf32, #tpu.memory_space<vmem>>, vector<1x1x8x16xf32>,
      %c0_89 = arith.constant 0 : index
      %c0_90 = arith.constant 0 : index
      %148 = vector.load %arg11[%c0_89, %c0_90] : memref<8x16xf32, #tpu.memory_space<vmem>>, vector<8x16xf32>
      %cst_91 = arith.constant 1.000000e+00 : f32
      %149 = vector.broadcast %cst_91 : f32 to vector<8x16xf32>
      %150 = arith.mulf %148, %149 : vector<8x16xf32>
      %c0_92 = arith.constant 0 : index
      %c1_93 = arith.constant 1 : index
      %c0_94 = arith.constant 0 : index
      %c0_95 = arith.constant 0 : index
      %151 = vector.load %arg9[%c0_92, %c1_93, %c0_94, %c0_95] : memref<1x4x8x16xf32, #tpu.memory_space<vmem>>, vector<1x1x8x16xf32>
      %152 = vector.shape_cast %151 : vector<1x1x8x16xf32> to vector<8x16xf32>
      %153 = vector.shape_cast %150 : vector<8x16xf32> to vector<1x1x8x16xf32>
      tpu.vector_store %arg9[%c0_92, %c1_93, %c0_94, %c0_95], %153 {strides = array<i32>} : memref<1x4x8x16xf32, #tpu.memory_space<vmem>>, vector<1x1x8x16xf32>,
      %c0_96 = arith.constant 0 : index
      %c0_97 = arith.constant 0 : index
      %154 = vector.load %arg13[%c0_96, %c0_97] : memref<8x16xf32, #tpu.memory_space<vmem>>, vector<8x16xf32>
      %cst_98 = arith.constant 1.000000e+00 : f32
      %155 = vector.broadcast %cst_98 : f32 to vector<8x16xf32>
      %156 = arith.mulf %154, %155 : vector<8x16xf32>
      %c0_99 = arith.constant 0 : index
      %c2_100 = arith.constant 2 : index
      %c0_101 = arith.constant 0 : index
      %c0_102 = arith.constant 0 : index
      %157 = vector.load %arg9[%c0_99, %c2_100, %c0_101, %c0_102] : memref<1x4x8x16xf32, #tpu.memory_space<vmem>>, vector<1x1x8x16xf32>
      %158 = vector.shape_cast %157 : vector<1x1x8x16xf32> to vector<8x16xf32>
      %159 = vector.shape_cast %156 : vector<8x16xf32> to vector<1x1x8x16xf32>
      tpu.vector_store %arg9[%c0_99, %c2_100, %c0_101, %c0_102], %159 {strides = array<i32>} : memref<1x4x8x16xf32, #tpu.memory_space<vmem>>, vector<1x1x8x16xf32>,
      %c0_103 = arith.constant 0 : index
      %c0_104 = arith.constant 0 : index
      %160 = vector.load %arg14[%c0_103, %c0_104] : memref<8x16xf32, #tpu.memory_space<vmem>>, vector<8x16xf32>
      %c0_105 = arith.constant 0 : index
      %c3_106 = arith.constant 3 : index
      %c0_107 = arith.constant 0 : index
      %c0_108 = arith.constant 0 : index
      %161 = vector.load %arg9[%c0_105, %c3_106, %c0_107, %c0_108] : memref<1x4x8x16xf32, #tpu.memory_space<vmem>>, vector<1x1x8x16xf32>
      %162 = vector.shape_cast %161 : vector<1x1x8x16xf32> to vector<8x16xf32>
      %163 = vector.shape_cast %160 : vector<8x16xf32> to vector<1x1x8x16xf32>
      tpu.vector_store %arg9[%c0_105, %c3_106, %c0_107, %c0_108], %163 {strides = array<i32>} : memref<1x4x8x16xf32, #tpu.memory_space<vmem>>, vector<1x1x8x16xf32>,
    } else {
    }
    return
  }
  func.func @transform_0(%arg0: i32, %arg1: i32, %arg2: i32) -> i32 {
    %c0_i32 = arith.constant 0 : i32
    %c0_i32_0 = arith.constant 0 : i32
    return %c0_i32 : i32
  }
  func.func @transform_1(%arg0: i32, %arg1: i32, %arg2: i32) -> i32 {
    %c0_i32 = arith.constant 0 : i32
    %c0_i32_0 = arith.constant 0 : i32
    return %c0_i32 : i32
  }
  func.func @transform_2(%arg0: i32, %arg1: i32, %arg2: i32) -> i32 {
    %c0_i32 = arith.constant 0 : i32
    %c0_i32_0 = arith.constant 0 : i32
    return %c0_i32 : i32
  }
  func.func @transform_3(%arg0: i32, %arg1: i32, %arg2: i32) -> (i32, i32, i32, i32) {
    %c0_i32 = arith.constant 0 : i32
    %c0_i32_0 = arith.constant 0 : i32
    return %arg0, %arg2, %arg1, %c0_i32 : i32, i32, i32, i32
  }
  func.func @transform_4(%arg0: i32, %arg1: i32, %arg2: i32) -> (i32, i32, i32, i32, i32) {
    %c0_i32 = arith.constant 0 : i32
    %c0_i32_0 = arith.constant 0 : i32
    %c0_i32_1 = arith.constant 0 : i32
    %c0_i32_2 = arith.constant 0 : i32
    return %arg0, %arg1, %c0_i32, %c0_i32_0, %c0_i32_1 : i32, i32, i32, i32, i32
  }
  func.func @transform_5(%arg0: i32, %arg1: i32, %arg2: i32) -> (i32, i32, i32, i32) {
    %c0_i32 = arith.constant 0 : i32
    %c0_i32_0 = arith.constant 0 : i32
    %c0_i32_1 = arith.constant 0 : i32
    return %arg0, %c0_i32, %arg1, %c0_i32_0 : i32, i32, i32, i32
  }
  func.func @transform_6(%arg0: i32, %arg1: i32, %arg2: i32) -> (i32, i32, i32, i32) {
    %c0_i32 = arith.constant 0 : i32
    %c0_i32_0 = arith.constant 0 : i32
    %c0_i32_1 = arith.constant 0 : i32
    return %arg0, %c0_i32, %arg1, %c0_i32_0 : i32, i32, i32, i32
  }
}

</mosaic_0001>

<bundles_post_ra>
// kernel: tpu_custom_call.1
= control target key start
LH: loop header
LB: loop body
LE: loop exit
PB: predicated region body
PF: predicated region fallthrough
CT: control target
= control target key end

     0   :  { %s1542_s0 = inlined_call_operand.vmem [shape: f32[5], index: 0, kind: input, shape index: {}]   ;;  %s1543_s1 = inlined_call_operand.vmem [shape: f32[5], index: 1, kind: input, shape index: {}]   ;;  %s1544_s2 = inlined_call_operand.vmem [shape: f32[25], index: 2, kind: input, shape index: {}]   ;;  %s1545_s3 = inlined_call_operand.vmem [shape: f32[2,25,8,16], index: 3, kind: input, shape index: {}]   ;;  %s1546_s4 = inlined_call_operand.vmem [shape: f32[2,1,3,12,20], index: 4, kind: input, shape index: {}]   ;;  %s1547_s5 = inlined_call_operand.hbm [shape: f32[2,3,8,16], index: 5, kind: output, shape index: {0}]   ;;  %s1548_s6 = inlined_call_operand.hbm [shape: f32[2,4,8,16], index: 6, kind: output, shape index: {1}]  }
   0x1   :  { %1556 = sst [smem:[#allocation24_spill]] %s1542_s0 }
   0x2   :  { %1557 = sst [smem:[#allocation25_spill]] %s1543_s1 }
   0x3   :  { %1558 = sst [smem:[#allocation26_spill]] %s1544_s2 }
   0x4   :  { %12 = vsyncpa [#allocation9], 0 }
   0x5   :  { %13 = vsyncpa [#allocation11], 0 }
   0x6   :  { %14 = vsyncpa [#allocation8], 0 }
   0x7   :  { %16 = vsyncpa [#allocation8 + $0x1], 0 }
   0x8   :  { %17 = vsyncpa [#allocation15], 0 }
   0x9   :  { %19 = vsyncpa [#allocation15 + $0x1], 0  ;;  %s1180_s21 = smov 0   ;;  %s1182_s22 = smov 0  }
   0xa   :  { %s1184_s23 = smov 0   ;;  %s1186_s24 = smov 0  }
   0xb   :  { %s1188_s25 = smov 0   ;;  %s1190_s26 = smov 0  }
   0xc   :  { %s1192_s27 = smov 0   ;;  %s1194_s28 = smov 0  }
   0xd LB: > { %1559 = sst [smem:[#allocation20_spill]] %s1123_s26  ;;  %s790_s29 = sadd.s32 4294967295, %s1131_s28   ;;  %s1131_s28 = sphi %s1194_s28, %s25_s28   ;;  %s1127_s27 = sphi %s1192_s27, %s1578_s27   ;;  %s1123_s26 = sphi %s1190_s26, %s1577_s26   ;;  %s1119_s25 = sphi %s1188_s25, %s1576_s25   ;;  %s1115_s24 = sphi %s1186_s24, %s1575_s24   ;;  %s1111_s23 = sphi %s1184_s23, %s1581_s23   ;;  %s1107_s22 = sphi %s1182_s22, %s1580_s22   ;;  %s1103_s21 = sphi %s1180_s21, %s1579_s21  }
   0xe   : > { %1560 = sst [smem:[#allocation21_spill]] %s1127_s27  ;;  %s791_s30 = sadd.s32 4294967294, %s1131_s28  }
   0xf   : > { %s37_s7 = sadd.s32 1, %s1123_s26  ;;  %s44_s8 = sadd.s32 1, %s1127_s27 }
  0x10   : > { %p38_p0 = scmp.ge.s32.totalorder %s37_s7, 5  ;;  %s174_s9 = sadd.s32 1, %s1111_s23 }
  0x11   : > { %p184_p1 = scmp.ne.s32.totalorder %s1111_s23, %s1107_s22  ;;  %p185_p2 = scmp.eq.s32.totalorder %s790_s29, 9 }
  0x12   : > { %s1583_s7 = smov (%p38_p0, %s37_s7), 0  ;;  %s1585_s8 = smov (!%p38_p0, %s44_s8), %s1127_s27 }
  0x13   : > { %1561 = sst [smem:[#allocation22_spill]] %s1583_s7  ;;  %p1230_p3 = por %p185_p2, %p184_p1 }
  0x14   : > { %p190_p4 = scmp.ne.s32.totalorder %s1107_s22, %s1103_s21  ;;  %p46_p5 = scmp.ge.s32.totalorder %s1585_s8, 2 }
  0x15   : > { %s1562_s10 = scalar_select %p1230_p3, 1, 0 }
  0x16   : > { %p191_p6 = scmp.eq.s32.totalorder %s791_s30, 9  ;;  %p792_p7 = scmp.ge.s32.totalorder %s1131_s28, 1 }
  0x17   : > { %p226_p8 = scmp.lt.s32.totalorder %s1131_s28, 11  ;;  %s1587_s8 = smov (%p46_p5, %s1585_s8), 0 }
  0x18   : > { %1563 = sst [smem:[#allocation23_spill]] %s1587_s8  ;;  %p1240_p9 = por %p191_p6, %p190_p4 }
  0x19   : > { %p1244_p10 = pnand %p792_p7, %p226_p8  ;;  %s169_s13 = ssub.s32 %s1127_s27, %s1587_s8 }
  0x1a   : > { %s1564_s11 = scalar_select %p1240_p9, 1, 0 }
  0x1b   : > { %s1565_s12 = scalar_select %p1244_p10, 1, 0 }
  0x1c   : > { %p172_p11 = scmp.eq.s32.totalorder %s169_s13, 0  ;;  %p844_p12 = pneg %p1244_p10 }
  0x1d   : > { %p1252_p13 = scmp.eq.s32.totalorder %s790_s29, 0  ;;  %s1567_s1 = sld [smem:[#allocation25_spill]] }
  0x1e   : > { %s1260_s18 = scalar_select %p172_p11, %s1111_s23, %s174_s9  }
  0x1f   : > { %s1566_s14 = scalar_select %p1252_p13, 1, 0 }
  0x20   : > { %p1264_p0 = pnand %p1252_p13, %p844_p12 }
  0x22   : > { %p954_p2 = pneg %p1264_p0 }
  0x23   : > { %s250_s17 = sshll.u32 %s1567_s1, 4  ;;  %s251_s17 = int_to_ptr.vmem [resolvable:$true] %s250_s17 }
  0x24   : > { %s952_s20 = scalar_lea.vmem %s251_s17, 16  ;;  %p960_p6 = scmp.lt.s32.totalorder %s251_s17, %s251_s17 }
  0x25   : > { %p953_p1 = scmp.ne.s32.totalorder %s251_s17, %s952_s20  ;;  %p961_p7 = scmp.lt.s32.totalorder %s952_s20, %s952_s20 }
  0x27   : > { %p955_p4 = pnand %p954_p2, %p953_p1  ;;  %p962_p8 = por %p961_p7, %p960_p6 }
  0x29   : > { %p956_p5 = pneg %p955_p4 }
  0x2b   : > { %p963_p11 = pnand %p962_p8, %p956_p5 }
  0x2d   : > { %966 = shalt.err (!%p963_p11)
}
  0x2e   : > { %s1133_s29 = smov [#allocation10]   ;;  %s1569_s0 = sld [smem:[#allocation24_spill]] }
  0x2f   : > { %850 = dma.vmem_to_smem (!%p1264_p0), %s251_s17, 16, %s1133_s29, [#allocation11]  }
  0x30   : > { %s1570_s2 = sld [smem:[#allocation26_spill]] }
  0x34   : > { %s239_s13 = sshll.u32 %s1569_s0, 4  ;;  %s240_s13 = int_to_ptr.vmem [resolvable:$true] %s239_s13 }
  0x35   : > { %s967_s8 = scalar_lea.vmem %s240_s13, 16  ;;  %p975_p5 = scmp.lt.s32.totalorder %s240_s13, %s240_s13 }
  0x36   : > { %s261_s1 = sshll.u32 %s1570_s2, 4  ;;  %p968_p12 = scmp.ne.s32.totalorder %s240_s13, %s967_s8  ;;  %s262_s1 = int_to_ptr.vmem [resolvable:$true] %s261_s1 }
  0x37   : > { %p976_p6 = scmp.lt.s32.totalorder %s967_s8, %s967_s8 }
  0x38   : > { %p970_p1 = pnand %p968_p12, %p954_p2 }
  0x39   : > { %p977_p7 = por %p976_p6, %p975_p5 }
  0x3a   : > { %p971_p4 = pneg %p970_p1 }
  0x3c   : > { %p978_p8 = pnand %p977_p7, %p971_p4 }
  0x3e   : > { %981 = shalt.err (!%p978_p8)
}
  0x3f   : > { %s1134_s17 = smov [#allocation7]   ;;  %s982_s20 = scalar_lea.vmem %s262_s1, 16 }
  0x40   : > { %847 = dma.vmem_to_smem (!%p1264_p0), %s240_s13, 16, %s1134_s17, [#allocation9]  }
  0x41   : > { %p983_p11 = scmp.ne.s32.totalorder %s262_s1, %s982_s20  ;;  %p990_p13 = scmp.lt.s32.totalorder %s262_s1, %s262_s1 }
  0x42   : > { %p991_p12 = scmp.lt.s32.totalorder %s982_s20, %s982_s20 }
  0x43   : > { %p985_p9 = pnand %p983_p11, %p954_p2 }
  0x44   : > { %p992_p1 = por %p991_p12, %p990_p13 }
  0x45   : > { %p986_p3 = pneg %p985_p9 }
  0x47   : > { %p993_p10 = pnand %p992_p1, %p986_p3 }
  0x49   : > { %996 = shalt.err (!%p993_p10)
}
  0x4a   : > { %s1135_s8 = smov [#allocation12]   ;;  %p1571_p4 = scmp.ne.s32.totalorder %s1565_s12, 0 }
  0x4b   : > { %853 = dma.vmem_to_smem (!%p1264_p0), %s262_s1, 16, %s1135_s8, [#allocation11]  }
  0x4c   : > { %302 = sbr.rel (%p1571_p4) target bundleno = 304 (0x130), region = 40  ;;  %p1572_p5 = scmp.ne.s32.totalorder (!%p1571_p4), %s1566_s14, 0 }
  0x53   : > { %1086 = dma.done.wait (%p1572_p5), [#allocation9], 16  }
  0x54   : > { %1088 = vsyncadd (%p1572_p5), [#allocation9], 4294967280 }
  0x55   : > { %1090 = dma.done.wait (%p1572_p5), [#allocation11], 32  }
  0x56   : > { %1092 = vsyncadd (%p1572_p5), [#allocation11], 4294967264 }
  0x57   : > { %316 = sfence }
  0x58   : > { %s1302_s1 = sand.u32 1, %s1107_s22   ;;  %s1305_s12 = smul.u32 5, %s1115_s24 }
  0x59   : > { %s824_s19 = smul.u32 24, %s1302_s1  ;;  %s801_s29 = sshll.u32 %s1302_s1, 5 }
  0x5a   : > { %p363_p3 = scmp.lt.s32.totalorder %s1119_s25, 1  ;;  %p365_p9 = scmp.lt.s32.totalorder %s1305_s12, 24 }
  0x5b   : > { %s1321_s27 = scalar_lea.vmem [#allocation13], %s824_s19  ;;  %s1323_s26 = scalar_lea.vmem [#allocation14], %s801_s29 }
  0x5c   : > { %s364_s30 = scalar_select %p363_p3, %s1119_s25, 1 }
  0x5d   : > { %s366_s14 = scalar_select %p365_p9, %s1305_s12, 24 }
  0x5e   : > { %s825_s9 = smul.u32 25, %s364_s30  ;;  %p804_p10 = scmp.ne.s32.totalorder %s1115_s24, 0 }
  0x5f   : > { %s826_s13 = smul.u32 48, %s364_s30  ;;  %vm388_vm0 = vcmask (!%p804_p10), 130048   ;;  %v1136_v0 = vmov (!%p804_p10), 0.0  }
  0x60   : > { %s371_s15 = sadd.s32 %s825_s9, %s366_s14  ;;  %387 = sbr.rel (%p804_p10) target bundleno = 103 (0x67), region = 56  ;;  %389 = vst.msk [vmem:[#allocation2] sm:$0xff] (!%p804_p10), %vm388_vm0, %v1136_v0  ;;  %390 = vst.msk [vmem:[#allocation2 + $0x8] sm:$0xff] (!%p804_p10), %vm388_vm0, %v1136_v0 }
  0x61   : > { %s802_s16 = sshll.u32 %s371_s15, 3  ;;  %s383_s8 = scalar_lea.vmem %s1546_s4, %s826_s13  ;;  %391 = vst.msk [vmem:[#allocation2 + $0x10] sm:$0xff] (!%p804_p10), %vm388_vm0, %v1136_v0  ;;  %392 = vst.msk [vmem:[#allocation3] sm:$0xff] (!%p804_p10), %vm388_vm0, %v1136_v0 }
  0x62   : > { %s1319_s7 = scalar_lea.vmem %s1545_s3, %s802_s16  ;;  %393 = vst.msk [vmem:[#allocation4] sm:$0xff] (!%p804_p10), %vm388_vm0, %v1136_v0  ;;  %394 = vst.msk [vmem:[#allocation5] sm:$0xff] (!%p804_p10), %vm388_vm0, %v1136_v0 }
  0x63   : > { %395 = vst.msk [vmem:[#allocation6] sm:$0xff] (!%p804_p10), %vm388_vm0, %v1136_v0 }
  0x67 PF: > { %s415_s0 = scalar_lea.vmem %s383_s8, %s1115_s24  ;;  %v805_v1 = vld [vmem:[%s1319_s7 + $0x8] sm:$0xff]  ;;  %v402_v2 = vld [vmem:[%s1319_s7] sm:$0xff]  ;;  %s1137_s2 = smov 127   ;;  %v807_v8 = vld [vmem:[%s1319_s7 + $0x10] sm:$0xff]  ;;  %vm544_vm1 = vcmask 130048  }
  0x68   : > { %v1329_v3 = vld [vmem:[%s415_s0 + $0x20] sm:$0xff]  ;;  %v427_v5 = vmul.f32 1.442695, %v805_v1  ;;  %v403_v6 = vmul.f32 1.442695, %v402_v2  ;;  %v1332_v7 = vld [vmem:[%s415_s0 + $0x10] sm:$0xff] }
  0x69   : > { %v416_v4 = vld [vmem:[%s415_s0] sm:$0xff]  ;;  %446 = vrot.lane.b32.xlu1 %v1329_v3, %s1137_s2  ;;  %v809_v9 = vld [vmem:[%s1319_s7 + $0x18] sm:$0xff]  ;;  %s434_s19 = sadd.s32 1, %s1305_s12  ;;  %v459_v10 = vmul.f32 1.442695, %v807_v8  ;;  %s1138_s29 = smov 126  }
  0x6a   : > { %442 = vrot.lane.b32.xlu0 %v416_v4, %s1137_s2  ;;  %942 = vpow2.f32 %v403_v6  ;;  %v488_v11 = vmul.f32 1.442695, %v809_v9  ;;  %s466_s30 = sadd.s32 2, %s1305_s12  ;;  %v811_v12 = vld [vmem:[%s1319_s7 + $0x20] sm:$0xff]  ;;  %s1340_s14 = sld [smem:[#allocation10 + $0x1]]  ;;  %v400_v33 = vld [vmem:[#allocation5] sm:$0xff] }
  0x6b   : > { %944 = vpow2.f32 %v427_v5  ;;  %s1342_s9 = sld [smem:[#allocation12 + %s434_s19]]  ;;  %s495_s15 = sadd.s32 3, %s1305_s12  ;;  %v517_v13 = vmul.f32 1.442695, %v811_v12  ;;  %v401_v24 = vld [vmem:[#allocation4] sm:$0xff]  ;;  %v550_v48 = vld [vmem:[#allocation6] sm:$0xff] }
  0x6c   : > { %s1344_s13 = sld [smem:[#allocation10 + $0x2]]  ;;  %946 = vpow2.f32 %v459_v10  ;;  %s406_s17 = sld [smem:[#allocation10]]  ;;  %v553_v55 = vld [vmem:[#allocation3] sm:$0xff]  ;;  %v398_v10 = vld [vmem:[#allocation2 + $0x8] sm:$0xff] }
  0x6d   : > { %471 = vrot.lane.b32.xlu1 %v416_v4, %s1138_s29  ;;  %s1347_s16 = sld [smem:[#allocation12 + %s466_s30]]  ;;  %948 = vpow2.f32 %v488_v11  ;;  %s524_s0 = sadd.s32 4, %s1305_s12 }
  0x6e   : > { %444 = vrot.lane.b32.xlu0 %v1332_v7, %s1137_s2  ;;  %s1351_s7 = sld [smem:[#allocation10 + $0x3]]  ;;  %950 = vpow2.f32 %v517_v13  ;;  %s1359_s2 = sld [smem:[#allocation10 + $0x4]] }
  0x6f   : > { %s1354_s20 = sld [smem:[#allocation12 + %s1305_s12]]  ;;  %s1139_s19 = smov 125  }
  0x70   : > { %s1356_s8 = sld [smem:[#allocation12 + %s495_s15]]  ;;  %v431_v15 = vstv %s1340_s14  ;;  %s1140_s12 = smov 124  }
  0x71   : > { %475 = vrot.lane.b32.xlu1 %v1329_v3, %s1138_s29  ;;  %s1362_s30 = sld [smem:[#allocation12 + %s524_s0]]  ;;  %v436_v16 = vstv %s1342_s9  ;;  %p813_p13 = scmp.ne.s32.totalorder %s1115_s24, 4 }
  0x72   : > { %473 = vrot.lane.b32.xlu0 %v1332_v7, %s1138_s29  ;;  %s1367_s29 = sld [smem:[#allocation7 + %s1115_s24]]  ;;  %v407_v17 = vstv %s406_s17  ;;  %v463_v23 = vstv %s1344_s13 }
  0x73   : > { %v468_v28 = vstv %s1347_s16 }
  0x74   : > { %v943_v14 = vpop.eup %942  ;;  %v492_v29 = vstv %s1351_s7  ;;  %v521_v41 = vstv %s1359_s2 }
  0x75   : > { %502 = vrot.lane.b32.xlu1 %v1332_v7, %s1139_s19  ;;  %v1369_v18 = vpop.eup %944  ;;  %v1372_v19 = vmul.f32 %v943_v14, %v1329_v3  ;;  %v419_v20 = vmul.f32 %v943_v14, %v416_v4  ;;  %v1375_v21 = vmul.f32 %v943_v14, %v1332_v7  ;;  %v408_v22 = vmul.f32 %v943_v14, %v407_v17 }
  0x76   : > { %500 = vrot.lane.b32.xlu0 %v416_v4, %s1139_s19  ;;  %v412_v25 = vstv %s1354_s20  ;;  %v429_v26 = vadd.f32 %v1369_v18, %v943_v14  ;;  %v432_v27 = vmul.f32 %v1369_v18, %v431_v15  ;;  %v1384_v30 = vpop.eup %946  ;;  %v437_v31 = vmul.f32 %v1369_v18, %v436_v16 }
  0x77   : > { %v497_v32 = vstv %s1356_s8  ;;  %v1388_v34 = vpop.eup %948  ;;  %v464_v35 = vmul.f32 %v1384_v30, %v463_v23  ;;  %v409_v36 = vadd.f32 %v408_v22, %v401_v24  ;;  %v413_v37 = vmul.f32 %v943_v14, %v412_v25 }
  0x78   : > { %v461_v38 = vadd.f32 %v1384_v30, %v429_v26  ;;  %v469_v39 = vmul.f32 %v1384_v30, %v468_v28  ;;  %v493_v40 = vmul.f32 %v1388_v34, %v492_v29  ;;  %v526_v42 = vstv %s1362_s30  ;;  %v1399_v46 = vpop.eup %950 }
  0x79   : > { %529 = vrot.lane.b32.xlu1 %v416_v4, %s1140_s12  ;;  %v414_v43 = vadd.f32 %v413_v37, %v400_v33  ;;  %v433_v44 = vadd.f32 %v432_v27, %v409_v36  ;;  %v498_v47 = vmul.f32 %v1388_v34, %v497_v32  ;;  %v554_v49 = vstv %s1367_s29  ;;  %v397_v4 = vld [vmem:[#allocation2] sm:$0xff] }
  0x7a   : > { %504 = vrot.lane.b32.xlu0 %v1329_v3, %s1139_s19  ;;  %v490_v45 = vadd.f32 %v1388_v34, %v461_v38  ;;  %v522_v50 = vmul.f32 %v1399_v46, %v521_v41  ;;  %v527_v54 = vmul.f32 %v1399_v46, %v526_v42  ;;  %v422_v8 = vadd.f32 %v419_v20, %v397_v4 }
  0x7b   : > { %v438_v51 = vadd.f32 %v437_v31, %v414_v43  ;;  %v465_v52 = vadd.f32 %v464_v35, %v433_v44  ;;  %v423_v14 = vadd.f32 %v1375_v21, %v398_v10 }
  0x7c   : > { %v519_v53 = vadd.f32 %v1399_v46, %v490_v45 }
  0x7d   : > { %533 = vrot.lane.b32.xlu1 %v1329_v3, %s1140_s12  ;;  %v470_v56 = vadd.f32 %v469_v39, %v438_v51  ;;  %v494_v57 = vadd.f32 %v493_v40, %v465_v52 }
  0x7e   : > { %531 = vrot.lane.b32.xlu0 %v1332_v7, %s1140_s12  ;;  %v551_v58 = vadd.f32 %v550_v48, %v519_v53  ;;  %v555_v59 = vmul.f32 %v554_v49, %v519_v53  ;;  %v399_v7 = vld [vmem:[#allocation2 + $0x10] sm:$0xff] }
  0x7f   : > { %v499_v60 = vadd.f32 %v498_v47, %v470_v56  ;;  %v523_v61 = vadd.f32 %v522_v50, %v494_v57  ;;  %v424_v12 = vadd.f32 %v1372_v19, %v399_v7 }
  0x80   : > { %552 = vst.msk [vmem:[#allocation6] sm:$0xff] %vm544_vm1, %v551_v58  ;;  %v556_v62 = vadd.f32 %v555_v59, %v553_v55 }
  0x81   : > { %v528_v63 = vadd.f32 %v527_v54, %v499_v60  ;;  %549 = vst.msk [vmem:[#allocation4] sm:$0xff] %vm544_vm1, %v523_v61 }
  0x82   : > { %557 = vst.msk [vmem:[#allocation3] sm:$0xff] %vm544_vm1, %v556_v62 }
  0x83   : > { %548 = vst.msk [vmem:[#allocation5] sm:$0xff] %vm544_vm1, %v528_v63 }
  0x87   : > { %v576_v48 = vld [vmem:[#allocation6] sm:$0xff] (!%p813_p13) }
  0x88   : > { %v568_v45 = vld [vmem:[#allocation4] sm:$0xff] (!%p813_p13)  ;;  %816 = vst.msk [vmem:[%s1323_s26 + $0x18] sm:$0xff] (!%p813_p13), %vm544_vm1, %v576_v48 }
  0x89   : > { %569 = vst.msk [vmem:[%s1323_s26] sm:$0xff] (!%p813_p13), %vm544_vm1, %v568_v45 }
  0x8a   : > { %v573_v47 = vld [vmem:[#allocation5] sm:$0xff] (!%p813_p13) }
  0x8b   : > { %815 = vst.msk [vmem:[%s1323_s26 + $0x10] sm:$0xff] (!%p813_p13), %vm544_vm1, %v573_v47 }
  0xdb   : > { %v447_v0 = vpop.permute.xlu1 %446 }
  0xdc   : > { %v443_v1 = vpop.permute.xlu0 %442  ;;  %v453_v13 = vmul.f32 %v1369_v18, %v447_v0 }
  0xdd   : > { %v451_v9 = vmul.f32 %v1369_v18, %v443_v1 }
  0xde   : > { %v456_v26 = vadd.f32 %v453_v13, %v424_v12 }
  0xdf   : > { %v472_v2 = vpop.permute.xlu1 %471  ;;  %v454_v22 = vadd.f32 %v451_v9, %v422_v8 }
  0xe0   : > { %v445_v3 = vpop.permute.xlu0 %444  ;;  %v480_v11 = vmul.f32 %v1384_v30, %v472_v2 }
  0xe1   : > { %v452_v15 = vmul.f32 %v1369_v18, %v445_v3 }
  0xe2   : > { %v483_v24 = vadd.f32 %v480_v11, %v454_v22 }
  0xe3   : > { %v476_v5 = vpop.permute.xlu1 %475  ;;  %v455_v27 = vadd.f32 %v452_v15, %v423_v14 }
  0xe4   : > { %v474_v6 = vpop.permute.xlu0 %473  ;;  %v482_v20 = vmul.f32 %v1384_v30, %v476_v5 }
  0xe5   : > { %v481_v25 = vmul.f32 %v1384_v30, %v474_v6 }
  0xe6   : > { %v485_v32 = vadd.f32 %v482_v20, %v456_v26 }
  0xe7   : > { %v503_v16 = vpop.permute.xlu1 %502  ;;  %v484_v33 = vadd.f32 %v481_v25, %v455_v27 }
  0xe8   : > { %v501_v17 = vpop.permute.xlu0 %500  ;;  %v510_v29 = vmul.f32 %v1388_v34, %v503_v16 }
  0xe9   : > { %v509_v23 = vmul.f32 %v1388_v34, %v501_v17 }
  0xea   : > { %v513_v38 = vadd.f32 %v510_v29, %v484_v33 }
  0xeb   : > { %v530_v28 = vpop.permute.xlu1 %529  ;;  %v512_v31 = vadd.f32 %v509_v23, %v483_v24 }
  0xec   : > { %v505_v19 = vpop.permute.xlu0 %504  ;;  %v538_v21 = vmul.f32 %v1399_v46, %v530_v28 }
  0xed   : > { %v511_v18 = vmul.f32 %v1388_v34, %v505_v19 }
  0xee   : > { %v541_v35 = vadd.f32 %v538_v21, %v512_v31 }
  0xef   : > { %v534_v36 = vpop.permute.xlu1 %533  ;;  %v514_v30 = vadd.f32 %v511_v18, %v485_v32  ;;  %561 = sbr.rel (%p813_p13) target bundleno = 254 (0xfe), region = 60 }
  0xf0   : > { %v532_v37 = vpop.permute.xlu0 %531  ;;  %545 = vst.msk [vmem:[#allocation2] sm:$0xff] %vm544_vm1, %v541_v35  ;;  %v540_v39 = vmul.f32 %v1399_v46, %v534_v36 }
  0xf1   : > { %v539_v40 = vmul.f32 %v1399_v46, %v532_v37  ;;  %v570_v46 = vld [vmem:[#allocation3] sm:$0xff] (!%p813_p13) }
  0xf2   : > { %v543_v41 = vadd.f32 %v540_v39, %v514_v30  ;;  %814 = vst.msk [vmem:[%s1323_s26 + $0x8] sm:$0xff] (!%p813_p13), %vm544_vm1, %v570_v46 }
  0xf3   : > { %v542_v42 = vadd.f32 %v539_v40, %v513_v38 }
  0xf4   : > { %547 = vst.msk [vmem:[#allocation2 + $0x10] sm:$0xff] %vm544_vm1, %v543_v41 }
  0xf5   : > { %546 = vst.msk [vmem:[#allocation2 + $0x8] sm:$0xff] %vm544_vm1, %v542_v42 }
  0xf7   : > { %v562_v34 = vld [vmem:[#allocation2] sm:$0xff] }
  0xf8   : > { %565 = vst.msk [vmem:[%s1321_s27] sm:$0xff] %vm544_vm1, %v562_v34 }
  0xfb   : > { %v564_v44 = vld [vmem:[#allocation2 + $0x10] sm:$0xff] }
  0xfc   : > { %v563_v43 = vld [vmem:[#allocation2 + $0x8] sm:$0xff]  ;;  %567 = vst.msk [vmem:[%s1321_s27 + $0x10] sm:$0xff] %vm544_vm1, %v564_v44 }
  0xfd   : > { %566 = vst.msk [vmem:[%s1321_s27 + $0x8] sm:$0xff] %vm544_vm1, %v563_v43 }
  0xfe PF: > { %s827_s24 = smul.u32 384, %s1119_s25  ;;  %s599_s14 = sshll.u32 %s1321_s27, 4  ;;  %s1449_s14 = int_to_ptr.vmem [resolvable:$true] %s599_s14 }
  0xff   : > { %s580_s16 = scalar_lea.sflag [#allocation8], %s1302_s1  ;;  %s997_s17 = scalar_lea.vmem %s1449_s14, 384 }
 0x100   : > { %s1447_s15 = scalar_lea.hbm %s1547_s5, %s827_s24  ;;  %p998_p0 = scmp.ne.s32.totalorder %s1449_s14, %s997_s17 }
 0x101   : > { %p1573_p2 = scmp.ne.s32.totalorder %s1562_s10, 0  ;;  %s1141_s7 = smov [#allocation13]  }
 0x102   : > { %s1001_s20 = sshll.u32 %s1141_s7, 4  ;;  %s1002_s20 = int_to_ptr.vmem [resolvable:$false] %s1001_s20 }
 0x103   : > { %p999_p6 = pnand %p998_p0, %p1573_p2  ;;  %s1003_s27 = scalar_lea.vmem %s1002_s20, 768 }
 0x104   : > { %p1004_p8 = scmp.lt.s32.totalorder %s1449_s14, %s1002_s20  ;;  %p1005_p11 = scmp.lt.s32.totalorder %s1003_s27, %s997_s17 }
 0x105   : > { %p1000_p7 = pneg %p999_p6 }
 0x106   : > { %p1006_p12 = por %p1005_p11, %p1004_p8 }
 0x108   : > { %p1007_p1 = pnand %p1006_p12, %p1000_p7 }
 0x10a   : > { %1010 = shalt.err (!%p1007_p1)
}
 0x10b   : > { %s1011_s8 = scalar_lea.hbm %s1447_s15, 384  ;;  %s1015_s19 = scalar_lea.hbm %s1547_s5, 768 }
 0x10c   : > { %p1012_p4 = scmp.ne.s32.totalorder %s1447_s15, %s1011_s8  ;;  %p1016_p9 = scmp.lt.u32.totalorder %s1447_s15, %s1547_s5 }
 0x10d   : > { %p1017_p10 = scmp.lt.u32.totalorder %s1015_s19, %s1011_s8  ;;  %p1019_p0 = scmp.lt.u32.totalorder %s1011_s8, %s1447_s15 }
 0x10e   : > { %p1013_p5 = pnand %p1012_p4, %p1573_p2 }
 0x10f   : > { %p1018_p13 = por %p1017_p10, %p1016_p9 }
 0x110   : > { %p1014_p3 = pneg %p1013_p5 }
 0x111   : > { %p1020_p6 = por %p1019_p0, %p1018_p13 }
 0x113   : > { %p1021_p7 = pnand %p1020_p6, %p1014_p3 }
 0x115   : > { %1024 = shalt.err (!%p1021_p7)
}
 0x116   : > { %s1142_s12 = smov 128   ;;  %s1143_s24 = smov 8  }
 0x117   : > { %840 = dma.vmem_to_hbm [thread:$0]  (%p1573_p2), %s1449_s14, 384, %s1447_s15, %s580_s16, %s1142_s12, %s1142_s12, %s1143_s24  }
 0x118   : > { %s823_s9 = sshll.u32 %s1119_s25, 9  ;;  %s616_s13 = sshll.u32 %s1323_s26, 4  ;;  %s1485_s13 = int_to_ptr.vmem [resolvable:$true] %s616_s13 }
 0x119   : > { %s1483_s20 = scalar_lea.hbm %s1548_s6, %s823_s9  ;;  %s585_s27 = scalar_lea.sflag [#allocation15], %s1302_s1 }
 0x11a   : > { %s1025_s8 = scalar_lea.vmem %s1485_s13, 512  ;;  %s1144_s0 = smov [#allocation14]  }
 0x11b   : > { %p1026_p8 = scmp.ne.s32.totalorder %s1485_s13, %s1025_s8  ;;  %s1029_s14 = sshll.u32 %s1144_s0, 4  ;;  %s1030_s14 = int_to_ptr.vmem [resolvable:$false] %s1029_s14 }
 0x11c   : > { %s1031_s25 = scalar_lea.vmem %s1030_s14, 1024  ;;  %p1032_p1 = scmp.lt.s32.totalorder %s1485_s13, %s1030_s14 }
 0x11d   : > { %p1027_p11 = pnand %p1026_p8, %p1573_p2  ;;  %p1033_p4 = scmp.lt.s32.totalorder %s1031_s25, %s1025_s8 }
 0x11f   : > { %p1028_p12 = pneg %p1027_p11  ;;  %p1034_p5 = por %p1033_p4, %p1032_p1 }
 0x121   : > { %p1035_p3 = pnand %p1034_p5, %p1028_p12 }
 0x123   : > { %1038 = shalt.err (!%p1035_p3)
}
 0x124   : > { %s1039_s26 = scalar_lea.hbm %s1483_s20, 512  ;;  %s1043_s2 = scalar_lea.hbm %s1548_s6, 1024 }
 0x125   : > { %p1040_p9 = scmp.ne.s32.totalorder %s1483_s20, %s1039_s26  ;;  %p1044_p0 = scmp.lt.u32.totalorder %s1483_s20, %s1548_s6 }
 0x126   : > { %p1045_p6 = scmp.lt.u32.totalorder %s1043_s2, %s1039_s26  ;;  %p1047_p8 = scmp.lt.u32.totalorder %s1039_s26, %s1483_s20 }
 0x127   : > { %p1041_p10 = pnand %p1040_p9, %p1573_p2 }
 0x128   : > { %p1046_p7 = por %p1045_p6, %p1044_p0 }
 0x129   : > { %p1042_p13 = pneg %p1041_p10 }
 0x12a   : > { %p1048_p11 = por %p1047_p8, %p1046_p7 }
 0x12c   : > { %p1049_p12 = pnand %p1048_p11, %p1042_p13 }
 0x12e   : > { %1052 = shalt.err (!%p1049_p12)
}
 0x12f   : > { %841 = dma.vmem_to_hbm [thread:$0]  (%p1573_p2), %s1485_s13, 512, %s1483_s20, %s585_s27, %s1142_s12, %s1142_s12, %s1143_s24  }
 0x130 PF: > { %p867_p1 = scmp.ge.s32.totalorder %s1131_s28, 2  ;;  %s631_s29 = sand.u32 1, %s1103_s21  }
 0x131   : > { %p1574_p4 = scmp.ne.s32.totalorder %s1564_s11, 0  ;;  %s632_s9 = scalar_lea.sflag [#allocation8], %s631_s29 }
 0x133   : > { %p855_p5 = pnand %p867_p1, %p1574_p4 }
 0x135   : > { %1094 = dma.done.wait (!%p855_p5), %s632_s9, 384  }
 0x136   : > { %1096 = vsyncadd (!%p855_p5), %s632_s9, 4294966912  ;;  %s641_s10 = scalar_lea.sflag [#allocation15], %s631_s29 }
 0x137   : > { %1098 = dma.done.wait (!%p855_p5), %s641_s10, 512  }
 0x138   : > { %1100 = vsyncadd (!%p855_p5), %s641_s10, 4294966784  ;;  %s25_s28 = sadd.s32 1, %s1131_s28   ;;  %s1575_s24 = sld [smem:[#allocation20_spill]] }
 0x139   : > { %p22_p3 = scmp.ge.s32.totalorder %s25_s28, 12   ;;  %s1576_s25 = sld [smem:[#allocation21_spill]] }
 0x13a   : > { %s1577_s26 = sld [smem:[#allocation22_spill]]  ;;  %s1578_s27 = sld [smem:[#allocation23_spill]] }
 0x13b   : > { %s1579_s21 = smov %s1107_s22  ;;  %s1580_s22 = smov %s1111_s23 }
 0x13c   : > { %s1581_s23 = smov %s1260_s18  ;;  %24 = sbr.rel (!%p22_p3) target bundleno = 13 (0xd), region = 124 }
 0x143   :  { %646 = vsyncpa [#allocation8], 1 }
 0x144   :  { %648 = vsyncpa [#allocation8 + $0x1], 1 }
 0x145   :  { %649 = vsyncpa [#allocation15], 1 }
 0x146   :  { %651 = vsyncpa [#allocation15 + $0x1], 1 }
 0x147   :  { %652 = vsyncpa [#allocation9], 1 }
 0x148   :  { %654 = vsyncpa [#allocation9 + $0x1], 1 }
 0x149   :  { %655 = vsyncpa [#allocation11], 1 }

</bundles_post_ra>
